<compile_context>
chip_gen: v5e
topology: v5e:2x2
jax: 0.10.0
libtpu: 0.0.40
codegen_flags: <defaults>
</compile_context>

<pallas_src>
import jax
import jax.numpy as jnp
from jax.experimental import pallas as pl
from jax.experimental.pallas import tpu as pltpu

_LANE = 128
_MIN_GRID_STEPS = 4     # enough steps for prefetch(i+1)/writeback(i-1) overlap
_MIN_BLOCK_ROWS = 512   # below this, per-step overhead dominates; use 1 block


def _exp_loss_kernel(logits_ref, labels_ref, out_ref):
    # Elementwise hot path: negate + multiply (VPU), exp (EUP).
    out_ref[...] = jnp.exp(-logits_ref[...] * labels_ref[...])


def _default_block_rows():
    """Generation-dependent block height (rows of 128 lanes).

    v6e / v7x: 32 MiB scoped-VMEM default and fast HBM -> 8192 rows
    (4 MiB per f32 buffer; 3 buffers x 2-deep double buffering = 24 MiB).
    v5e and older / unknown: 16 MiB scoped-VMEM default -> 4096 rows (12 MiB).
    """
    try:
        kind = jax.devices()[0].device_kind.lower()
    except Exception:
        kind = ""
    if "v6" in kind or "v7" in kind or "7x" in kind:
        return 8192
    return 4096


def _row_align(dtype):
    # Sublane packing: 8 rows for 32-bit, 16 for 16-bit, 32 for 8-bit dtypes,
    # so (partial) edge blocks stay cleanly tiled.
    itemsize = jnp.dtype(dtype).itemsize
    return 8 * max(1, 4 // itemsize)


def _pick_block_rows(rows, max_rows, align):
    """Rows per block.

    Small arrays: one block (full row extent).  Larger arrays: the biggest
    multiple-of-`align` block <= max_rows that still yields at least
    _MIN_GRID_STEPS grid steps, so the pipeline can overlap DMA with compute
    (grid=1 has no pipeline and exposes the exp/VPU time plus output DMA).
    """
    if rows <= _MIN_BLOCK_ROWS:
        if max_rows >= rows:
            return rows                                   # single full block
        return max(align, (max_rows // align) * align)
    br = max(_MIN_BLOCK_ROWS, rows // _MIN_GRID_STEPS)
    br = min(br, max_rows)
    return max(align, (br // align) * align)


def _compiler_params():
    # "parallel" lets v7x shard the row-block axis across its two TensorCores;
    # on v5e/v6e (single TC) it is a measured no-op.
    # TODO(synk): if an xprof profile shows one v7x TC idle, switch to
    # pltpu.CORE_PARALLEL (or pl.core_map with an explicit leading axis of 2).
    return pltpu.CompilerParams(dimension_semantics=("parallel",))


def _cost(n, dtype):
    itemsize = jnp.dtype(dtype).itemsize
    return pl.CostEstimate(
        flops=2 * n,            # negate + multiply
        transcendentals=n,      # exp
        bytes_accessed=3 * n * itemsize,
    )


def _exp_loss_2d(logits, labels, max_rows):
    """128-multiple lengths: stream through a free (rows, 128) bitcast view."""
    n = logits.shape[0]
    rows = n // _LANE
    br = _pick_block_rows(rows, max_rows, _row_align(logits.dtype))
    grid = pl.cdiv(rows, br)
    logits2d = logits.reshape(rows, _LANE)
    labels2d = labels.reshape(rows, _LANE)
    out2d = pl.pallas_call(
        _exp_loss_kernel,
        out_shape=jax.ShapeDtypeStruct((rows, _LANE), logits.dtype),
        grid_spec=pltpu.PrefetchScalarGridSpec(
            num_scalar_prefetch=0,
            grid=(grid,),
            in_specs=[pl.BlockSpec((br, _LANE), lambda i: (i, 0)),
                      pl.BlockSpec((br, _LANE), lambda i: (i, 0))],
            out_specs=pl.BlockSpec((br, _LANE), lambda i: (i, 0)),
        ),
        compiler_params=_compiler_params(),
        cost_estimate=_cost(n, logits.dtype),
    )(logits2d, labels2d)
    return out2d.reshape(n)


def _exp_loss_1d(logits, labels, max_rows):
    """Ragged (n % 128 != 0) lengths: one kernel over the flat 1-D arrays.

    No pad / slice / concatenate in the wrapper, so the only HBM traffic is
    the kernel's 2 reads + 1 write.  The last (partial) block is handled by
    the grid with masked edge stores.
    """
    n = logits.shape[0]
    rows = pl.cdiv(n, _LANE)
    br = _pick_block_rows(rows, max_rows, _row_align(logits.dtype))
    if br >= rows:
        be, grid = n, 1                    # one full-extent block (any n)
    else:
        be = br * _LANE                    # multiple of 128
        grid = pl.cdiv(n, be)
    return pl.pallas_call(
        _exp_loss_kernel,
        out_shape=jax.ShapeDtypeStruct((n,), logits.dtype),
        grid_spec=pltpu.PrefetchScalarGridSpec(
            num_scalar_prefetch=0,
            grid=(grid,),
            in_specs=[pl.BlockSpec((be,), lambda i: (i,)),
                      pl.BlockSpec((be,), lambda i: (i,))],
            out_specs=pl.BlockSpec((be,), lambda i: (i,)),
        ),
        compiler_params=_compiler_params(),
        cost_estimate=_cost(n, logits.dtype),
    )(logits, labels)


def exp_loss(logits: jax.Array, labels: jax.Array, block_rows=None) -> jax.Array:
    assert logits.shape == labels.shape
    assert logits.ndim == 1
    n = logits.shape[0]
    if n == 0:
        return jnp.zeros((0,), logits.dtype)
    max_rows = _default_block_rows() if block_rows is None else block_rows

    if n % _LANE == 0:
        return _exp_loss_2d(logits, labels, max_rows)

    try:
        return _exp_loss_1d(logits, labels, max_rows)
    except Exception:
        # Safety net (eager only): if this Mosaic build rejects the ragged 1-D
        # lowering, fall back to kernel-on-prefix + jnp tail + concatenate.
        n_main = (n // _LANE) * _LANE
        pieces = []
        if n_main > 0:
            pieces.append(_exp_loss_2d(logits[:n_main], labels[:n_main], max_rows))
        pieces.append(jnp.exp(-logits[n_main:] * labels[n_main:]))
        return pieces[0] if len(pieces) == 1 else jnp.concatenate(pieces)


if __name__ == "__main__":
    key = jax.random.PRNGKey(0)
    k1, k2 = jax.random.split(key)

    # Ragged length (not a multiple of 128): single 1-D kernel, no concatenate.
    N = 2000
    logits = jax.random.normal(k1, (N,), dtype=jnp.float32)
    labels = jax.random.normal(k2, (N,), dtype=jnp.float32)
    ref = jnp.exp(-logits * labels)
    out = jax.block_until_ready(exp_loss(logits, labels))
    assert out.shape == (N,)
    assert jnp.allclose(out, ref, rtol=1e-6, atol=1e-6)

    # Ragged + small block: multi-step grid with a partial last block.
    out2 = jax.block_until_ready(exp_loss(logits, labels, block_rows=8))
    assert jnp.allclose(out2, ref, rtol=1e-6, atol=1e-6)

    # 128-multiple length, small: 2-D path, single full-extent block.
    M = 1024
    lg = jax.random.normal(k1, (M,), dtype=jnp.float32)
    lb = jax.random.normal(k2, (M,), dtype=jnp.float32)
    out3 = jax.block_until_ready(exp_loss(lg, lb))
    assert jnp.allclose(out3, jnp.exp(-lg * lb), rtol=1e-6, atol=1e-6)

    # 128-multiple length, larger: pipelined multi-step 2-D grid (rows=600).
    P = 600 * _LANE
    lg2 = jax.random.normal(k1, (P,), dtype=jnp.float32)
    lb2 = jax.random.normal(k2, (P,), dtype=jnp.float32)
    out4 = jax.block_until_ready(exp_loss(lg2, lb2))
    assert jnp.allclose(out4, jnp.exp(-lg2 * lb2), rtol=1e-6, atol=1e-6)

    # bf16 in / bf16 out: halves HBM traffic on this bandwidth-bound op.
    Q = 256 * _LANE
    lg3 = jax.random.normal(k1, (Q,), dtype=jnp.bfloat16)
    lb3 = jax.random.normal(k2, (Q,), dtype=jnp.bfloat16)
    out5 = jax.block_until_ready(exp_loss(lg3, lb3))
    assert out5.dtype == jnp.bfloat16
    ref_bf16 = jnp.exp(-(lg3 * lb3).astype(jnp.float32))
    assert jnp.allclose(out5.astype(jnp.float32), ref_bf16, rtol=0.1, atol=1e-2)

    print("KERNEL_OK")
</pallas_src>

<mosaic_0001>
module attributes {stable_mosaic.version = 11 : i64} {
  func.func @_exp_loss_kernel(%arg0: i32, %arg1: memref<15x128xf32, #tpu.memory_space<vmem>>, %arg2: memref<15x128xf32, #tpu.memory_space<vmem>>, %arg3: memref<15x128xf32, #tpu.memory_space<vmem>>) attributes {dimension_semantics = [#tpu.dimension_semantics<parallel>], iteration_bounds = array<i64: 1>, scalar_prefetch = 0 : i64, scratch_operands = 0 : i64, tpu.core_type = #tpu.core_type<tc>, window_params = [{transform_indices = @transform_0, window_bounds = array<i64: 15, 128>}, {transform_indices = @transform_1, window_bounds = array<i64: 15, 128>}, {transform_indices = @transform_2, window_bounds = array<i64: 15, 128>}]} {
    %c0 = arith.constant 0 : index
    %c0_0 = arith.constant 0 : index
    %0 = vector.load %arg1[%c0, %c0_0] : memref<15x128xf32, #tpu.memory_space<vmem>>, vector<15x128xf32>
    %cst = arith.constant 0.000000e+00 : f32
    %1 = vector.broadcast %cst : f32 to vector<15x128xf32>
    %2 = arith.subf %1, %0 : vector<15x128xf32>
    %c0_1 = arith.constant 0 : index
    %c0_2 = arith.constant 0 : index
    %3 = vector.load %arg2[%c0_1, %c0_2] : memref<15x128xf32, #tpu.memory_space<vmem>>, vector<15x128xf32>
    %4 = arith.mulf %2, %3 : vector<15x128xf32>
    %5 = math.exp %4 : vector<15x128xf32>
    %c0_3 = arith.constant 0 : index
    %c0_4 = arith.constant 0 : index
    %6 = vector.load %arg3[%c0_3, %c0_4] : memref<15x128xf32, #tpu.memory_space<vmem>>, vector<15x128xf32>
    tpu.vector_store %arg3[%c0_3, %c0_4], %5 {strides = array<i32>} : memref<15x128xf32, #tpu.memory_space<vmem>>, vector<15x128xf32>,
    return
  }
  func.func @transform_0(%arg0: i32) -> (i32, i32) {
    %c0_i32 = arith.constant 0 : i32
    %c0_i32_0 = arith.constant 0 : i32
    return %arg0, %c0_i32 : i32, i32
  }
  func.func @transform_1(%arg0: i32) -> (i32, i32) {
    %c0_i32 = arith.constant 0 : i32
    %c0_i32_0 = arith.constant 0 : i32
    return %arg0, %c0_i32 : i32, i32
  }
  func.func @transform_2(%arg0: i32) -> (i32, i32) {
    %c0_i32 = arith.constant 0 : i32
    %c0_i32_0 = arith.constant 0 : i32
    return %arg0, %c0_i32 : i32, i32
  }
}

</mosaic_0001>

<bundles_post_ra>
// kernel: tpu_custom_call.1
= control target key start
LH: loop header
LB: loop body
LE: loop exit
PB: predicated region body
PF: predicated region fallthrough
CT: control target
= control target key end

     0   :  { %7 = vsyncpa [#allocation3], 0  ;;  %s203_s0 = inlined_call_operand.hbm [shape: f32[15,128], index: 0, kind: input, shape index: {}]   ;;  %s204_s1 = inlined_call_operand.hbm [shape: f32[15,128], index: 1, kind: input, shape index: {}]   ;;  %s205_s2 = inlined_call_operand.hbm [shape: f32[15,128], index: 2, kind: output, shape index: {}]  }
   0x1   :  { %8 = vsyncpa [#allocation6], 0 }
   0x2   :  { %9 = vsyncpa [#allocation4], 0  ;;  %s14_s11 = sshll.u32 %s203_s0, 4  ;;  %s165_s12 = smov [#allocation2]   ;;  %s15_s11 = int_to_ptr.hbm [resolvable:$true] %s14_s11 }
   0x3   :  { %s16_s13 = sshll.u32 %s165_s12, 4  ;;  %s27_s16 = sshll.u32 %s204_s1, 4  ;;  %s17_s13 = int_to_ptr.vmem [resolvable:$true] %s16_s13  ;;  %s28_s16 = int_to_ptr.hbm [resolvable:$true] %s27_s16 }
   0x4   :  { %s166_s17 = smov 128   ;;  %s167_s18 = smov 8  }
   0x5   :  { %22 = dma.hbm_to_vmem [thread:$0]  %s15_s11, 256, %s17_s13, [#allocation3], %s166_s17, %s166_s17, %s167_s18  }
   0x6   :  { %s168_s19 = smov [#allocation5]  }
   0x7   :  { %s29_s20 = sshll.u32 %s168_s19, 4  ;;  %s30_s20 = int_to_ptr.vmem [resolvable:$true] %s29_s20 }
   0x8   :  { %35 = dma.hbm_to_vmem [thread:$0]  %s28_s16, 256, %s30_s20, [#allocation6], %s166_s17, %s166_s17, %s167_s18  }
   0x9   :  { %159 = dma.done.wait [#allocation3], 256  }
   0xa   :  { %160 = vsyncadd [#allocation3], 4294967040 }
   0xb   :  { %161 = dma.done.wait [#allocation6], 256  }
   0xc   :  { %162 = vsyncadd [#allocation6], 4294967040  ;;  %v44_v0 = vld [vmem:[#allocation2] sm:$0xff]  ;;  %v48_v1 = vld [vmem:[#allocation5] sm:$0xff]  ;;  %s169_s0 = smov [#allocation7]   ;;  %s64_s23 = sshll.u32 %s205_s2, 4  ;;  %s65_s23 = int_to_ptr.hbm [resolvable:$true] %s64_s23 }
   0xd   :  { %v45_v2 = vld [vmem:[#allocation2 + $0x8] sm:$0x7f]  ;;  %v46_v3 = vsub.f32 0.0, %v44_v0  ;;  %v49_v5 = vld [vmem:[#allocation5 + $0x8] sm:$0x7f]  ;;  %s62_s1 = sshll.u32 %s169_s0, 4  ;;  %s63_s1 = int_to_ptr.vmem [resolvable:$true] %s62_s1 }
   0xe   :  { %v47_v4 = vsub.f32 0.0, %v45_v2 }
   0xf   :  { %v50_v6 = vmul.f32 %v48_v1, %v46_v3 }
  0x10   :  { %v51_v7 = vmul.f32 %v49_v5, %v47_v4 }
  0x11   :  { %v52_v8 = vmul.f32 1.442695, %v50_v6 }
  0x12   :  { %v54_v9 = vmul.f32 1.442695, %v51_v7 }
  0x13   :  { %83 = vpow2.f32 %v52_v8 }
  0x14   :  { %85 = vpow2.f32 %v54_v9 }
  0x19   :  { %v84_v10 = vpop.eup %83 }
  0x1a   :  { %v86_v11 = vpop.eup %85  ;;  %56 = vst [vmem:[#allocation7] sm:$0xff] %v84_v10 }
  0x1b   :  { %57 = vst [vmem:[#allocation7 + $0x8] sm:$0x7f] %v86_v11 }
  0x1c   :  { %70 = dma.vmem_to_hbm [thread:$0]  %s63_s1, 256, %s65_s23, [#allocation4], %s166_s17, %s166_s17, %s167_s18  }
  0x1d   :  { %163 = dma.done.wait [#allocation4], 256  }
  0x1e   :  { %164 = vsyncadd [#allocation4], 4294967040 }
  0x1f   :  { %75 = vsyncpa [#allocation3], 1 }
  0x20   :  { %76 = vsyncpa [#allocation6], 1 }
  0x21   :  { %77 = vsyncpa [#allocation4], 1 }

</bundles_post_ra>
